<compile_context>
chip_gen: v6e
topology: v6e:2x2x1
jax: 0.10.0
libtpu: 0.0.40
codegen_flags: <defaults>
</compile_context>

<pallas_src>
import functools

import jax
import jax.numpy as jnp
from jax import lax
from jax.experimental import pallas as pl
from jax.experimental.pallas import tpu as pltpu


def _round_up(x, m):
    return ((x + m - 1) // m) * m


def _dot_nt(x, w):
    # (tm, tk) x (tn, tk) -> (tm, tn), contracting the shared K axis on the
    # MXU with f32 accumulation; no transpose copy is materialized.
    return lax.dot_general(
        x, w,
        dimension_numbers=(((1,), (1,)), ((), ())),
        preferred_element_type=jnp.float32)


def _linear_kernel_single_k(x_ref, w_ref, b_ref, o_ref):
    # Whole-K tile: fused matmul + bias + cast, direct lane-dense store.
    o_ref[...] = (_dot_nt(x_ref[...], w_ref[...])
                  + b_ref[...].astype(jnp.float32)).astype(o_ref.dtype)


def _linear_kernel_multi_k(x_ref, w_ref, b_ref, o_ref, acc_ref):
    # x_ref: (tm, tk)  w_ref: (tn, tk)  b_ref: (1, tn)  o_ref: (tm, tn)
    k = pl.program_id(2)

    @pl.when(k == 0)
    def _():
        acc_ref[...] = jnp.zeros_like(acc_ref)

    acc_ref[...] += _dot_nt(x_ref[...], w_ref[...])

    @pl.when(k == pl.num_programs(2) - 1)
    def _():
        o_ref[...] = (acc_ref[...] + b_ref[...].astype(jnp.float32)
                      ).astype(o_ref.dtype)


@functools.partial(jax.jit, static_argnames=("block_m", "block_n", "block_k"))
def linear_norm(x, weight, bias, *, block_m=512, block_n=512, block_k=1024):
    """y = x @ weight.T + bias.  x: (..., in_dim); weight: (out_dim, in_dim)."""
    *lead, in_dim = x.shape
    out_dim = weight.shape[0]
    m = 1
    for d in lead:
        m *= d
    x2d = x.reshape(m, in_dim)

    # Tile sizes: lane-aligned (multiple of 128) N/K tiles, sublane-aligned
    # (multiple of 8) M tile, capped at the configured block sizes.
    tm = min(block_m, _round_up(m, 8))
    tn = min(block_n, _round_up(out_dim, 128))
    tk = min(block_k, _round_up(in_dim, 128))
    mp = _round_up(m, tm)
    np_ = _round_up(out_dim, tn)
    kp = _round_up(in_dim, tk)

    # Zero-pad to tile multiples (zeros contribute nothing to the matmul;
    # padded rows/cols are sliced off below).  No-op for aligned shapes.
    if (mp, kp) != (m, in_dim):
        x2d = jnp.pad(x2d, ((0, mp - m), (0, kp - in_dim)))
    w = weight
    if (np_, kp) != (out_dim, in_dim):
        w = jnp.pad(w, ((0, np_ - out_dim), (0, kp - in_dim)))
    b = bias
    if np_ != out_dim:
        b = jnp.pad(b, (0, np_ - out_dim))
    b2d = b.reshape(1, np_)

    grid_k = kp // tk
    grid = (mp // tm, np_ // tn, grid_k)
    single_k = grid_k == 1

    itemsize = jnp.dtype(x.dtype).itemsize
    # Double-buffered x/w/bias/out tiles (+ f32 accumulator if multi-K).
    tile_bytes = 2 * (tm * tk + tn * tk + tm * tn + tn) * itemsize
    if not single_k:
        tile_bytes += tm * tn * 4
    vmem_limit = min(max(32 * 1024 * 1024, int(1.5 * tile_bytes)),
                     64 * 1024 * 1024)

    cost = pl.CostEstimate(
        flops=2 * m * in_dim * out_dim,
        transcendentals=0,
        bytes_accessed=(m * in_dim + out_dim * in_dim + out_dim
                        + m * out_dim) * itemsize)

    kernel = _linear_kernel_single_k if single_k else _linear_kernel_multi_k
    scratch_shapes = [] if single_k else [pltpu.VMEM((tm, tn), jnp.float32)]

    out = pl.pallas_call(
        kernel,
        out_shape=jax.ShapeDtypeStruct((mp, np_), x.dtype),
        grid_spec=pltpu.PrefetchScalarGridSpec(
            num_scalar_prefetch=0,
            grid=grid,
            in_specs=[
                pl.BlockSpec((tm, tk), lambda i, j, k: (i, k)),   # x tile
                pl.BlockSpec((tn, tk), lambda i, j, k: (j, k)),   # W tile
                pl.BlockSpec((1, tn), lambda i, j, k: (0, j)),    # bias tile
            ],
            out_specs=pl.BlockSpec((tm, tn), lambda i, j, k: (i, j)),
            scratch_shapes=scratch_shapes,
        ),
        compiler_params=pltpu.CompilerParams(
            dimension_semantics=("parallel", "parallel", "arbitrary"),
            vmem_limit_bytes=vmem_limit),
        cost_estimate=cost,
    )(x2d, w, b2d)

    out = out[:m, :out_dim]
    return out.reshape(*lead, out_dim)


def init_linear_norm_params(key, in_dim, out_dim, w_init_gain="linear"):
    """Deterministic synthetic init matching LinearNorm.__init__ semantics."""
    kw, kb = jax.random.split(key)
    gain = 1.0  # nn.init.calculate_gain('linear') == 1.0
    bound_w = gain * (6.0 / (in_dim + out_dim)) ** 0.5  # xavier_uniform_
    weight = jax.random.uniform(
        kw, (out_dim, in_dim), jnp.float32, minval=-bound_w, maxval=bound_w)
    bound_b = 1.0 / (in_dim ** 0.5)  # PyTorch nn.Linear default bias init
    bias = jax.random.uniform(
        kb, (out_dim,), jnp.float32, minval=-bound_b, maxval=bound_b)
    return weight, bias


if __name__ == "__main__":
    key = jax.random.PRNGKey(0)
    k_x, k_p, k_x2, k_p2 = jax.random.split(key, 4)

    # Case 1: small shapes, single-K fused path.
    batch, seq, in_dim, out_dim = 2, 8, 32, 32
    x = jax.random.normal(k_x, (batch, seq, in_dim), jnp.float32)
    weight, bias = init_linear_norm_params(k_p, in_dim, out_dim)
    y = linear_norm(x, weight, bias)
    jax.block_until_ready(y)
    y_ref = x @ weight.T + bias
    assert y.shape == (batch, seq, out_dim)
    assert jnp.allclose(y, y_ref, atol=1e-5, rtol=1e-5)

    # Case 2: force the multi-K accumulator path (grid_k = 2).
    in_dim2, out_dim2 = 256, 64
    x2 = jax.random.normal(k_x2, (batch, seq, in_dim2), jnp.float32)
    weight2, bias2 = init_linear_norm_params(k_p2, in_dim2, out_dim2)
    y2 = linear_norm(x2, weight2, bias2, block_k=128)
    jax.block_until_ready(y2)
    y2_ref = x2 @ weight2.T + bias2
    assert y2.shape == (batch, seq, out_dim2)
    assert jnp.allclose(y2, y2_ref, atol=1e-5, rtol=1e-5)

    print("KERNEL_OK")
</pallas_src>

<mosaic_0001>
module attributes {stable_mosaic.version = 11 : i64} {
  func.func @_linear_kernel_single_k(%arg0: i32, %arg1: i32, %arg2: i32, %arg3: memref<16x128xf32, #tpu.memory_space<vmem>>, %arg4: memref<128x128xf32, #tpu.memory_space<vmem>>, %arg5: memref<1x128xf32, #tpu.memory_space<vmem>>, %arg6: memref<16x128xf32, #tpu.memory_space<vmem>>) attributes {dimension_semantics = [#tpu.dimension_semantics<parallel>, #tpu.dimension_semantics<parallel>, #tpu.dimension_semantics<arbitrary>], iteration_bounds = array<i64: 1, 1, 1>, scalar_prefetch = 0 : i64, scratch_operands = 0 : i64, tpu.core_type = #tpu.core_type<tc>, window_params = [{transform_indices = @transform_0, window_bounds = array<i64: 16, 128>}, {transform_indices = @transform_1, window_bounds = array<i64: 128, 128>}, {transform_indices = @transform_2, window_bounds = array<i64: 1, 128>}, {transform_indices = @transform_3, window_bounds = array<i64: 16, 128>}]} {
    %c0 = arith.constant 0 : index
    %c0_0 = arith.constant 0 : index
    %0 = vector.load %arg3[%c0, %c0_0] : memref<16x128xf32, #tpu.memory_space<vmem>>, vector<16x128xf32>
    %c0_1 = arith.constant 0 : index
    %c0_2 = arith.constant 0 : index
    %1 = vector.load %arg4[%c0_1, %c0_2] : memref<128x128xf32, #tpu.memory_space<vmem>>, vector<128x128xf32>
    %cst = arith.constant dense<0.000000e+00> : vector<16x128xf32>
    %2 = tpu.matmul %0, %1, %cst {dimension_numbers = #tpu.dot_dimension_numbers<[1], [1], [0], [0], [0, 0, 1, 0], [], []>} : vector<16x128xf32>, vector<128x128xf32>, vector<16x128xf32> -> vector<16x128xf32>
    %c0_3 = arith.constant 0 : index
    %c0_4 = arith.constant 0 : index
    %3 = vector.load %arg5[%c0_3, %c0_4] : memref<1x128xf32, #tpu.memory_space<vmem>>, vector<1x128xf32>
    %4 = vector.broadcast %3 : vector<1x128xf32> to vector<16x128xf32>
    %5 = arith.addf %2, %4 : vector<16x128xf32>
    %c0_5 = arith.constant 0 : index
    %c0_6 = arith.constant 0 : index
    %6 = vector.load %arg6[%c0_5, %c0_6] : memref<16x128xf32, #tpu.memory_space<vmem>>, vector<16x128xf32>
    tpu.vector_store %arg6[%c0_5, %c0_6], %5 {strides = array<i32>} : memref<16x128xf32, #tpu.memory_space<vmem>>, vector<16x128xf32>,
    return
  }
  func.func @transform_0(%arg0: i32, %arg1: i32, %arg2: i32) -> (i32, i32) {
    %c0_i32 = arith.constant 0 : i32
    return %arg0, %arg2 : i32, i32
  }
  func.func @transform_1(%arg0: i32, %arg1: i32, %arg2: i32) -> (i32, i32) {
    %c0_i32 = arith.constant 0 : i32
    return %arg1, %arg2 : i32, i32
  }
  func.func @transform_2(%arg0: i32, %arg1: i32, %arg2: i32) -> (i32, i32) {
    %c0_i32 = arith.constant 0 : i32
    %c0_i32_0 = arith.constant 0 : i32
    return %c0_i32, %arg1 : i32, i32
  }
  func.func @transform_3(%arg0: i32, %arg1: i32, %arg2: i32) -> (i32, i32) {
    %c0_i32 = arith.constant 0 : i32
    return %arg0, %arg1 : i32, i32
  }
}

</mosaic_0001>

<bundles_post_ra>
// kernel: linear_norm.1
= control target key start
LH: loop header
LB: loop body
LE: loop exit
PB: predicated region body
PF: predicated region fallthrough
CT: control target
= control target key end

     0   :  { %s257_s1 = inlined_call_operand.vmem [shape: f32[128,128], index: 1, kind: input, shape index: {}]   ;;  %s258_s0 = inlined_call_operand.vmem [shape: f32[16,128], index: 0, kind: input, shape index: {}]   ;;  %s259_s2 = inlined_call_operand.vmem [shape: f32[1,128], index: 2, kind: input, shape index: {}]   ;;  %s260_s3 = inlined_call_operand.vmem [shape: f32[16,128], index: 3, kind: output, shape index: {}]  }
   0x1   :  { %v31_v0 = vld [vmem:[%s257_s1 + $0x78] sm:$0xff]  ;;  %v30_v1 = vld [vmem:[%s257_s1 + $0x70] sm:$0xff]  ;;  %v29_v2 = vld [vmem:[%s257_s1 + $0x68] sm:$0xff] }
   0x2   :  { %139 = vmatprep.subr.mxu0 %v31_v0  ;;  %v14_v3 = vld [vmem:[%s258_s0] sm:$0xff]  ;;  %v27_v5 = vld [vmem:[%s257_s1 + $0x58] sm:$0xff]  ;;  %v26_v6 = vld [vmem:[%s257_s1 + $0x50] sm:$0xff] }
   0x3   :  { %140 = vmatpush3.xpose.msra.mxu0 %v31_v0  ;;  %171 = vmatprep.mubr.f32.mxu0 %v14_v3  ;;  %v28_v4 = vld [vmem:[%s257_s1 + $0x60] sm:$0xff]  ;;  %v25_v7 = vld [vmem:[%s257_s1 + $0x48] sm:$0xff]  ;;  %v23_v9 = vld [vmem:[%s257_s1 + $0x38] sm:$0xff] }
   0x4   :  { %141 = vmatprep.subr.mxu0 %v30_v1  ;;  %v24_v8 = vld [vmem:[%s257_s1 + $0x40] sm:$0xff]  ;;  %v22_v10 = vld [vmem:[%s257_s1 + $0x30] sm:$0xff]  ;;  %v21_v11 = vld [vmem:[%s257_s1 + $0x28] sm:$0xff] }
   0x5   :  { %v20_v12 = vld [vmem:[%s257_s1 + $0x20] sm:$0xff]  ;;  %v19_v13 = vld [vmem:[%s257_s1 + $0x18] sm:$0xff]  ;;  %v18_v14 = vld [vmem:[%s257_s1 + $0x10] sm:$0xff] }
   0x6   :  { %v17_v15 = vld [vmem:[%s257_s1 + $0x8] sm:$0xff]  ;;  %v16_v16 = vld [vmem:[%s257_s1] sm:$0xff] }
   0x7   :  { %142 = vmatpush3.xpose.msra.mxu0 %v30_v1  ;;  %v15_v17 = vld [vmem:[%s258_s0 + $0x8] sm:$0xff]  ;;  %v120_v18 = vld [vmem:[%s259_s2] ss:$0 sm:$0xff] }
   0x8   :  { %143 = vmatprep.subr.mxu0 %v29_v2 }
   0xb   :  { %144 = vmatpush3.xpose.msra.mxu0 %v29_v2 }
   0xc   :  { %145 = vmatprep.subr.mxu0 %v28_v4 }
   0xf   :  { %146 = vmatpush3.xpose.msra.mxu0 %v28_v4 }
  0x10   :  { %147 = vmatprep.subr.mxu0 %v27_v5 }
  0x13   :  { %148 = vmatpush3.xpose.msra.mxu0 %v27_v5 }
  0x14   :  { %149 = vmatprep.subr.mxu0 %v26_v6 }
  0x17   :  { %150 = vmatpush3.xpose.msra.mxu0 %v26_v6 }
  0x18   :  { %151 = vmatprep.subr.mxu0 %v25_v7 }
  0x1b   :  { %152 = vmatpush3.xpose.msra.mxu0 %v25_v7 }
  0x1c   :  { %153 = vmatprep.subr.mxu0 %v24_v8 }
  0x1f   :  { %154 = vmatpush3.xpose.msra.mxu0 %v24_v8 }
  0x20   :  { %155 = vmatprep.subr.mxu0 %v23_v9 }
  0x23   :  { %156 = vmatpush3.xpose.msra.mxu0 %v23_v9 }
  0x24   :  { %157 = vmatprep.subr.mxu0 %v22_v10 }
  0x27   :  { %158 = vmatpush3.xpose.msra.mxu0 %v22_v10 }
  0x28   :  { %159 = vmatprep.subr.mxu0 %v21_v11 }
  0x2b   :  { %160 = vmatpush3.xpose.msra.mxu0 %v21_v11 }
  0x2c   :  { %161 = vmatprep.subr.mxu0 %v20_v12 }
  0x2f   :  { %162 = vmatpush3.xpose.msra.mxu0 %v20_v12 }
  0x30   :  { %163 = vmatprep.subr.mxu0 %v19_v13 }
  0x33   :  { %164 = vmatpush3.xpose.msra.mxu0 %v19_v13 }
  0x34   :  { %165 = vmatprep.subr.mxu0 %v18_v14 }
  0x37   :  { %166 = vmatpush3.xpose.msra.mxu0 %v18_v14 }
  0x38   :  { %167 = vmatprep.subr.mxu0 %v17_v15 }
  0x3b   :  { %168 = vmatpush3.xpose.msra.mxu0 %v17_v15 }
  0x3c   :  { %169 = vmatprep.subr.mxu0 %v16_v16 }
  0x3f   :  { %170 = vmatpush3.xpose.msra.mxu0 %v16_v16 }
  0x42   :  { %172 = vmatmul.mubr.f32.vlgmr.msra.gmra.mxu0 %v15_v17 }
 0x102   :  { %v173_v19 = vpop.f32.mrf.mxu0 }
 0x103   :  { %v111_v20 = vadd.f32 %v173_v19, %v120_v18 }
 0x104   :  { %v105_v21 = vpop.f32.mrf.mxu0 }
 0x105   :  { %115 = vst [vmem:[%s260_s3 + $0x8] sm:$0xff] %v111_v20  ;;  %v106_v22 = vadd.f32 %v120_v18, %v105_v21 }
 0x107   :  { %114 = vst [vmem:[%s260_s3] sm:$0xff] %v106_v22 }

</bundles_post_ra>
